<compile_context>
chip_gen: v5e
topology: v5e:2x2
jax: 0.10.0
libtpu: 0.0.40
codegen_flags: <defaults>
</compile_context>

<pallas_src>
import jax
import jax.numpy as jnp
from jax import lax
from jax.experimental import pallas as pl
from jax.experimental.pallas import tpu as pltpu

NUM_HIDDEN_LAYERS = 1
# Spec uses 256; scaled down to 32 for the small self-test (4H = 128 = one
# full lane width, which keeps every matmul RHS lane-dense).
NUM_HIDDEN_NEURONS = 32


def _lstm_fc_kernel(x_ref, w_ih_t_ref, w_hh_t_ref, b_ref, w_fc_t_ref, b_fc_ref,
                    out_ref, xp_ref):
    """Single-invocation LSTM + Linear forward.

    x_ref      : (T*B, I)   time-major flattened input
    w_ih_t_ref : (I, 4H)    pre-transposed input weights
    w_hh_t_ref : (H, 4H)    pre-transposed recurrent weights
    b_ref      : (1, 4H)    combined bias b_ih + b_hh
    w_fc_t_ref : (H, O)     pre-transposed fc weights
    b_fc_ref   : (1, O)
    out_ref    : (B, O)
    xp_ref     : (T*B, 4H)  VMEM scratch holding the hoisted input projection
    """
    B = out_ref.shape[0]
    H = w_hh_t_ref.shape[0]
    T = x_ref.shape[0] // B

    # ---- Hoisted input projection: one MXU push for all T timesteps. -------
    xp_ref[...] = (
        jnp.dot(x_ref[...], w_ih_t_ref[...], preferred_element_type=jnp.float32)
        + b_ref[...]
    )

    # ---- Loop-invariant weight load (hoisted out of the recurrence). -------
    w_hh_t = w_hh_t_ref[...]

    def step(t, carry):
        h, c = carry
        xp_t = xp_ref[pl.ds(t * B, B), :]                       # (B, 4H)
        gates = xp_t + jnp.dot(h, w_hh_t,
                               preferred_element_type=jnp.float32)
        # Gate order [i, f, g, o]; static lane-offset slices of one vreg.
        i_g = jax.nn.sigmoid(gates[:, 0 * H:1 * H])
        f_g = jax.nn.sigmoid(gates[:, 1 * H:2 * H])
        g_g = jnp.tanh(gates[:, 2 * H:3 * H])
        o_g = jax.nn.sigmoid(gates[:, 3 * H:4 * H])
        c_new = f_g * c + i_g * g_g
        h_new = o_g * jnp.tanh(c_new)
        return (h_new, c_new)

    h0 = jnp.zeros((B, H), jnp.float32)
    c0 = jnp.zeros((B, H), jnp.float32)
    # Short fixed trip-count recurrence: fully unrolled for LLO visibility.
    h_last, _ = lax.fori_loop(0, T, step, (h0, c0), unroll=True)

    # TODO(synk): nn.Dropout is identity in eval mode; training-mode dropout
    # would need pltpu.prng_seed / prng_random_bits masking here.
    # Final Linear layer. O=1 -> masked 1-lane store, but it happens once.
    out_ref[...] = (
        jnp.dot(h_last, w_fc_t_ref[...], preferred_element_type=jnp.float32)
        + b_fc_ref[...]
    ).astype(out_ref.dtype)


@jax.jit
def lstm_model_forward(x, w_ih, w_hh, b_ih, b_hh, w_fc, b_fc):
    B, T, I = x.shape
    H = w_hh.shape[1]
    O = w_fc.shape[0]

    # Wrapper-side layout plumbing (cheap XLA ops): time-major flatten of x,
    # pre-transposed / lane-dense weights, combined bias. Keeps the kernel's
    # recurrent critical path free of transposes and broadcasts.
    x2d = jnp.transpose(x, (1, 0, 2)).reshape(T * B, I).astype(jnp.float32)
    w_ih_t = w_ih.T.astype(jnp.float32)                    # (I, 4H)
    w_hh_t = w_hh.T.astype(jnp.float32)                    # (H, 4H)
    b_comb = (b_ih + b_hh).reshape(1, 4 * H).astype(jnp.float32)
    w_fc_t = w_fc.T.astype(jnp.float32)                    # (H, O)
    b_fc2 = b_fc.reshape(1, O).astype(jnp.float32)

    # Single invocation (no grid): everything is resident in VMEM (<100 KB),
    # so no pipelining / double-buffering is needed.
    # TODO(synk): if batch grows, add a leading "parallel" batch-tile grid axis
    # so v7x's second TensorCore can shard the recurrence over batch.
    return pl.pallas_call(
        _lstm_fc_kernel,
        out_shape=jax.ShapeDtypeStruct((B, O), jnp.float32),
        in_specs=[pl.BlockSpec(memory_space=pltpu.MemorySpace.VMEM)] * 6,
        out_specs=pl.BlockSpec(memory_space=pltpu.MemorySpace.VMEM),
        scratch_shapes=[pltpu.VMEM((T * B, 4 * H), jnp.float32)],
    )(x2d, w_ih_t, w_hh_t, b_comb, w_fc_t, b_fc2)


def _reference_forward(x, w_ih, w_hh, b_ih, b_hh, w_fc, b_fc):
    """Pure-JAX reference matching torch.nn.LSTM (1 layer) + Linear."""
    B, T, I = x.shape
    H = w_hh.shape[1]
    h = jnp.zeros((B, H), jnp.float32)
    c = jnp.zeros((B, H), jnp.float32)

    def step(carry, x_t):
        h, c = carry
        gates = x_t @ w_ih.T + h @ w_hh.T + b_ih + b_hh
        i = jax.nn.sigmoid(gates[:, 0 * H:1 * H])
        f = jax.nn.sigmoid(gates[:, 1 * H:2 * H])
        g = jnp.tanh(gates[:, 2 * H:3 * H])
        o = jax.nn.sigmoid(gates[:, 3 * H:4 * H])
        c = f * c + i * g
        h = o * jnp.tanh(c)
        return (h, c), None

    (h, _), _ = lax.scan(step, (h, c), jnp.swapaxes(x, 0, 1))
    return h @ w_fc.T + b_fc


if __name__ == "__main__":
    # Small shapes consistent with the module's forward.
    batch, seq, input_size = 2, 8, 4
    hidden = NUM_HIDDEN_NEURONS      # 32
    output_size = 1

    key = jax.random.PRNGKey(0)
    ks = jax.random.split(key, 7)
    bound = 1.0 / jnp.sqrt(hidden)

    w_ih = jax.random.uniform(ks[0], (4 * hidden, input_size), jnp.float32, -bound, bound)
    w_hh = jax.random.uniform(ks[1], (4 * hidden, hidden), jnp.float32, -bound, bound)
    b_ih = jax.random.uniform(ks[2], (4 * hidden,), jnp.float32, -bound, bound)
    b_hh = jax.random.uniform(ks[3], (4 * hidden,), jnp.float32, -bound, bound)
    w_fc = jax.random.uniform(ks[4], (output_size, hidden), jnp.float32, -bound, bound)
    b_fc = jax.random.uniform(ks[5], (output_size,), jnp.float32, -bound, bound)
    x = jax.random.normal(ks[6], (batch, seq, input_size), jnp.float32)

    out = lstm_model_forward(x, w_ih, w_hh, b_ih, b_hh, w_fc, b_fc)
    out = jax.block_until_ready(out)

    ref = _reference_forward(x, w_ih, w_hh, b_ih, b_hh, w_fc, b_fc)
    assert out.shape == (batch, output_size)
    assert jnp.allclose(out, ref, atol=1e-5, rtol=1e-5), (out, ref)

    print("KERNEL_OK")
</pallas_src>

<mosaic_0001>
module attributes {stable_mosaic.version = 11 : i64} {
  func.func @_lstm_fc_kernel(%arg0: memref<16x4xf32, #tpu.memory_space<vmem>>, %arg1: memref<4x128xf32, #tpu.memory_space<vmem>>, %arg2: memref<32x128xf32, #tpu.memory_space<vmem>>, %arg3: memref<1x128xf32, #tpu.memory_space<vmem>>, %arg4: memref<32x1xf32, #tpu.memory_space<vmem>>, %arg5: memref<1x1xf32, #tpu.memory_space<vmem>>, %arg6: memref<2x1xf32, #tpu.memory_space<vmem>>, %arg7: memref<16x128xf32, #tpu.memory_space<vmem>>) attributes {dimension_semantics = [], scalar_prefetch = 0 : i64, scratch_operands = 1 : i64, tpu.core_type = #tpu.core_type<tc>} {
    %c0 = arith.constant 0 : index
    %c0_0 = arith.constant 0 : index
    %0 = vector.load %arg0[%c0, %c0_0] : memref<16x4xf32, #tpu.memory_space<vmem>>, vector<16x4xf32>
    %c0_1 = arith.constant 0 : index
    %c0_2 = arith.constant 0 : index
    %1 = vector.load %arg1[%c0_1, %c0_2] : memref<4x128xf32, #tpu.memory_space<vmem>>, vector<4x128xf32>
    %cst = arith.constant dense<0.000000e+00> : vector<16x128xf32>
    %2 = tpu.matmul %0, %1, %cst {dimension_numbers = #tpu.dot_dimension_numbers<[1], [0], [0], [1], [0, 0, 1, 1], [], []>} : vector<16x4xf32>, vector<4x128xf32>, vector<16x128xf32> -> vector<16x128xf32>
    %c0_3 = arith.constant 0 : index
    %c0_4 = arith.constant 0 : index
    %3 = vector.load %arg3[%c0_3, %c0_4] : memref<1x128xf32, #tpu.memory_space<vmem>>, vector<1x128xf32>
    %4 = vector.broadcast %3 : vector<1x128xf32> to vector<16x128xf32>
    %5 = arith.addf %2, %4 : vector<16x128xf32>
    %c0_5 = arith.constant 0 : index
    %c0_6 = arith.constant 0 : index
    %6 = vector.load %arg7[%c0_5, %c0_6] : memref<16x128xf32, #tpu.memory_space<vmem>>, vector<16x128xf32>
    tpu.vector_store %arg7[%c0_5, %c0_6], %5 {strides = array<i32>} : memref<16x128xf32, #tpu.memory_space<vmem>>, vector<16x128xf32>,
    %c0_7 = arith.constant 0 : index
    %c0_8 = arith.constant 0 : index
    %7 = vector.load %arg2[%c0_7, %c0_8] : memref<32x128xf32, #tpu.memory_space<vmem>>, vector<32x128xf32>
    %cst_9 = arith.constant 0.000000e+00 : f32
    %8 = vector.broadcast %cst_9 : f32 to vector<2x32xf32>
    %cst_10 = arith.constant 0.000000e+00 : f32
    %9 = vector.broadcast %cst_10 : f32 to vector<2x32xf32>
    %c0_i32 = arith.constant 0 : i32
    %c2_i32 = arith.constant 2 : i32
    %10 = arith.muli %c0_i32, %c2_i32 : i32
    %11 = arith.index_cast %10 : i32 to index
    %c0_11 = arith.constant 0 : index
    %12 = vector.load %arg7[%11, %c0_11] : memref<16x128xf32, #tpu.memory_space<vmem>>, vector<2x128xf32>
    %cst_12 = arith.constant dense<0.000000e+00> : vector<2x128xf32>
    %13 = tpu.matmul %8, %7, %cst_12 {dimension_numbers = #tpu.dot_dimension_numbers<[1], [0], [0], [1], [0, 0, 1, 1], [], []>} : vector<2x32xf32>, vector<32x128xf32>, vector<2x128xf32> -> vector<2x128xf32>
    %14 = arith.addf %12, %13 : vector<2x128xf32>
    %15 = vector.extract_strided_slice %14 {offsets = [0, 0], sizes = [2, 32], strides = [1, 1]} : vector<2x128xf32> to vector<2x32xf32>
    %16 = arith.negf %15 : vector<2x32xf32>
    %17 = math.exp %16 : vector<2x32xf32>
    %cst_13 = arith.constant 1.000000e+00 : f32
    %18 = vector.broadcast %cst_13 : f32 to vector<2x32xf32>
    %19 = arith.addf %18, %17 : vector<2x32xf32>
    %20 = arith.divf %18, %19 : vector<2x32xf32>
    %21 = vector.extract_strided_slice %14 {offsets = [0, 32], sizes = [2, 32], strides = [1, 1]} : vector<2x128xf32> to vector<2x32xf32>
    %22 = arith.negf %21 : vector<2x32xf32>
    %23 = math.exp %22 : vector<2x32xf32>
    %cst_14 = arith.constant 1.000000e+00 : f32
    %24 = vector.broadcast %cst_14 : f32 to vector<2x32xf32>
    %25 = arith.addf %24, %23 : vector<2x32xf32>
    %26 = arith.divf %24, %25 : vector<2x32xf32>
    %27 = vector.extract_strided_slice %14 {offsets = [0, 64], sizes = [2, 32], strides = [1, 1]} : vector<2x128xf32> to vector<2x32xf32>
    %28 = math.tanh %27 : vector<2x32xf32>
    %29 = vector.extract_strided_slice %14 {offsets = [0, 96], sizes = [2, 32], strides = [1, 1]} : vector<2x128xf32> to vector<2x32xf32>
    %30 = arith.negf %29 : vector<2x32xf32>
    %31 = math.exp %30 : vector<2x32xf32>
    %cst_15 = arith.constant 1.000000e+00 : f32
    %32 = vector.broadcast %cst_15 : f32 to vector<2x32xf32>
    %33 = arith.addf %32, %31 : vector<2x32xf32>
    %34 = arith.divf %32, %33 : vector<2x32xf32>
    %35 = arith.mulf %26, %9 : vector<2x32xf32>
    %36 = arith.mulf %20, %28 : vector<2x32xf32>
    %37 = arith.addf %35, %36 : vector<2x32xf32>
    %38 = math.tanh %37 : vector<2x32xf32>
    %39 = arith.mulf %34, %38 : vector<2x32xf32>
    %c1_i32 = arith.constant 1 : i32
    %c2_i32_16 = arith.constant 2 : i32
    %40 = arith.muli %c1_i32, %c2_i32_16 : i32
    %41 = arith.index_cast %40 : i32 to index
    %c0_17 = arith.constant 0 : index
    %42 = vector.load %arg7[%41, %c0_17] : memref<16x128xf32, #tpu.memory_space<vmem>>, vector<2x128xf32>
    %cst_18 = arith.constant dense<0.000000e+00> : vector<2x128xf32>
    %43 = tpu.matmul %39, %7, %cst_18 {dimension_numbers = #tpu.dot_dimension_numbers<[1], [0], [0], [1], [0, 0, 1, 1], [], []>} : vector<2x32xf32>, vector<32x128xf32>, vector<2x128xf32> -> vector<2x128xf32>
    %44 = arith.addf %42, %43 : vector<2x128xf32>
    %45 = vector.extract_strided_slice %44 {offsets = [0, 0], sizes = [2, 32], strides = [1, 1]} : vector<2x128xf32> to vector<2x32xf32>
    %46 = arith.negf %45 : vector<2x32xf32>
    %47 = math.exp %46 : vector<2x32xf32>
    %cst_19 = arith.constant 1.000000e+00 : f32
    %48 = vector.broadcast %cst_19 : f32 to vector<2x32xf32>
    %49 = arith.addf %48, %47 : vector<2x32xf32>
    %50 = arith.divf %48, %49 : vector<2x32xf32>
    %51 = vector.extract_strided_slice %44 {offsets = [0, 32], sizes = [2, 32], strides = [1, 1]} : vector<2x128xf32> to vector<2x32xf32>
    %52 = arith.negf %51 : vector<2x32xf32>
    %53 = math.exp %52 : vector<2x32xf32>
    %cst_20 = arith.constant 1.000000e+00 : f32
    %54 = vector.broadcast %cst_20 : f32 to vector<2x32xf32>
    %55 = arith.addf %54, %53 : vector<2x32xf32>
    %56 = arith.divf %54, %55 : vector<2x32xf32>
    %57 = vector.extract_strided_slice %44 {offsets = [0, 64], sizes = [2, 32], strides = [1, 1]} : vector<2x128xf32> to vector<2x32xf32>
    %58 = math.tanh %57 : vector<2x32xf32>
    %59 = vector.extract_strided_slice %44 {offsets = [0, 96], sizes = [2, 32], strides = [1, 1]} : vector<2x128xf32> to vector<2x32xf32>
    %60 = arith.negf %59 : vector<2x32xf32>
    %61 = math.exp %60 : vector<2x32xf32>
    %cst_21 = arith.constant 1.000000e+00 : f32
    %62 = vector.broadcast %cst_21 : f32 to vector<2x32xf32>
    %63 = arith.addf %62, %61 : vector<2x32xf32>
    %64 = arith.divf %62, %63 : vector<2x32xf32>
    %65 = arith.mulf %56, %37 : vector<2x32xf32>
    %66 = arith.mulf %50, %58 : vector<2x32xf32>
    %67 = arith.addf %65, %66 : vector<2x32xf32>
    %68 = math.tanh %67 : vector<2x32xf32>
    %69 = arith.mulf %64, %68 : vector<2x32xf32>
    %c2_i32_22 = arith.constant 2 : i32
    %c2_i32_23 = arith.constant 2 : i32
    %70 = arith.muli %c2_i32_22, %c2_i32_23 : i32
    %71 = arith.index_cast %70 : i32 to index
    %c0_24 = arith.constant 0 : index
    %72 = vector.load %arg7[%71, %c0_24] : memref<16x128xf32, #tpu.memory_space<vmem>>, vector<2x128xf32>
    %cst_25 = arith.constant dense<0.000000e+00> : vector<2x128xf32>
    %73 = tpu.matmul %69, %7, %cst_25 {dimension_numbers = #tpu.dot_dimension_numbers<[1], [0], [0], [1], [0, 0, 1, 1], [], []>} : vector<2x32xf32>, vector<32x128xf32>, vector<2x128xf32> -> vector<2x128xf32>
    %74 = arith.addf %72, %73 : vector<2x128xf32>
    %75 = vector.extract_strided_slice %74 {offsets = [0, 0], sizes = [2, 32], strides = [1, 1]} : vector<2x128xf32> to vector<2x32xf32>
    %76 = arith.negf %75 : vector<2x32xf32>
    %77 = math.exp %76 : vector<2x32xf32>
    %cst_26 = arith.constant 1.000000e+00 : f32
    %78 = vector.broadcast %cst_26 : f32 to vector<2x32xf32>
    %79 = arith.addf %78, %77 : vector<2x32xf32>
    %80 = arith.divf %78, %79 : vector<2x32xf32>
    %81 = vector.extract_strided_slice %74 {offsets = [0, 32], sizes = [2, 32], strides = [1, 1]} : vector<2x128xf32> to vector<2x32xf32>
    %82 = arith.negf %81 : vector<2x32xf32>
    %83 = math.exp %82 : vector<2x32xf32>
    %cst_27 = arith.constant 1.000000e+00 : f32
    %84 = vector.broadcast %cst_27 : f32 to vector<2x32xf32>
    %85 = arith.addf %84, %83 : vector<2x32xf32>
    %86 = arith.divf %84, %85 : vector<2x32xf32>
    %87 = vector.extract_strided_slice %74 {offsets = [0, 64], sizes = [2, 32], strides = [1, 1]} : vector<2x128xf32> to vector<2x32xf32>
    %88 = math.tanh %87 : vector<2x32xf32>
    %89 = vector.extract_strided_slice %74 {offsets = [0, 96], sizes = [2, 32], strides = [1, 1]} : vector<2x128xf32> to vector<2x32xf32>
    %90 = arith.negf %89 : vector<2x32xf32>
    %91 = math.exp %90 : vector<2x32xf32>
    %cst_28 = arith.constant 1.000000e+00 : f32
    %92 = vector.broadcast %cst_28 : f32 to vector<2x32xf32>
    %93 = arith.addf %92, %91 : vector<2x32xf32>
    %94 = arith.divf %92, %93 : vector<2x32xf32>
    %95 = arith.mulf %86, %67 : vector<2x32xf32>
    %96 = arith.mulf %80, %88 : vector<2x32xf32>
    %97 = arith.addf %95, %96 : vector<2x32xf32>
    %98 = math.tanh %97 : vector<2x32xf32>
    %99 = arith.mulf %94, %98 : vector<2x32xf32>
    %c3_i32 = arith.constant 3 : i32
    %c2_i32_29 = arith.constant 2 : i32
    %100 = arith.muli %c3_i32, %c2_i32_29 : i32
    %101 = arith.index_cast %100 : i32 to index
    %c0_30 = arith.constant 0 : index
    %102 = vector.load %arg7[%101, %c0_30] : memref<16x128xf32, #tpu.memory_space<vmem>>, vector<2x128xf32>
    %cst_31 = arith.constant dense<0.000000e+00> : vector<2x128xf32>
    %103 = tpu.matmul %99, %7, %cst_31 {dimension_numbers = #tpu.dot_dimension_numbers<[1], [0], [0], [1], [0, 0, 1, 1], [], []>} : vector<2x32xf32>, vector<32x128xf32>, vector<2x128xf32> -> vector<2x128xf32>
    %104 = arith.addf %102, %103 : vector<2x128xf32>
    %105 = vector.extract_strided_slice %104 {offsets = [0, 0], sizes = [2, 32], strides = [1, 1]} : vector<2x128xf32> to vector<2x32xf32>
    %106 = arith.negf %105 : vector<2x32xf32>
    %107 = math.exp %106 : vector<2x32xf32>
    %cst_32 = arith.constant 1.000000e+00 : f32
    %108 = vector.broadcast %cst_32 : f32 to vector<2x32xf32>
    %109 = arith.addf %108, %107 : vector<2x32xf32>
    %110 = arith.divf %108, %109 : vector<2x32xf32>
    %111 = vector.extract_strided_slice %104 {offsets = [0, 32], sizes = [2, 32], strides = [1, 1]} : vector<2x128xf32> to vector<2x32xf32>
    %112 = arith.negf %111 : vector<2x32xf32>
    %113 = math.exp %112 : vector<2x32xf32>
    %cst_33 = arith.constant 1.000000e+00 : f32
    %114 = vector.broadcast %cst_33 : f32 to vector<2x32xf32>
    %115 = arith.addf %114, %113 : vector<2x32xf32>
    %116 = arith.divf %114, %115 : vector<2x32xf32>
    %117 = vector.extract_strided_slice %104 {offsets = [0, 64], sizes = [2, 32], strides = [1, 1]} : vector<2x128xf32> to vector<2x32xf32>
    %118 = math.tanh %117 : vector<2x32xf32>
    %119 = vector.extract_strided_slice %104 {offsets = [0, 96], sizes = [2, 32], strides = [1, 1]} : vector<2x128xf32> to vector<2x32xf32>
    %120 = arith.negf %119 : vector<2x32xf32>
    %121 = math.exp %120 : vector<2x32xf32>
    %cst_34 = arith.constant 1.000000e+00 : f32
    %122 = vector.broadcast %cst_34 : f32 to vector<2x32xf32>
    %123 = arith.addf %122, %121 : vector<2x32xf32>
    %124 = arith.divf %122, %123 : vector<2x32xf32>
    %125 = arith.mulf %116, %97 : vector<2x32xf32>
    %126 = arith.mulf %110, %118 : vector<2x32xf32>
    %127 = arith.addf %125, %126 : vector<2x32xf32>
    %128 = math.tanh %127 : vector<2x32xf32>
    %129 = arith.mulf %124, %128 : vector<2x32xf32>
    %c4_i32 = arith.constant 4 : i32
    %c2_i32_35 = arith.constant 2 : i32
    %130 = arith.muli %c4_i32, %c2_i32_35 : i32
    %131 = arith.index_cast %130 : i32 to index
    %c0_36 = arith.constant 0 : index
    %132 = vector.load %arg7[%131, %c0_36] : memref<16x128xf32, #tpu.memory_space<vmem>>, vector<2x128xf32>
    %cst_37 = arith.constant dense<0.000000e+00> : vector<2x128xf32>
    %133 = tpu.matmul %129, %7, %cst_37 {dimension_numbers = #tpu.dot_dimension_numbers<[1], [0], [0], [1], [0, 0, 1, 1], [], []>} : vector<2x32xf32>, vector<32x128xf32>, vector<2x128xf32> -> vector<2x128xf32>
    %134 = arith.addf %132, %133 : vector<2x128xf32>
    %135 = vector.extract_strided_slice %134 {offsets = [0, 0], sizes = [2, 32], strides = [1, 1]} : vector<2x128xf32> to vector<2x32xf32>
    %136 = arith.negf %135 : vector<2x32xf32>
    %137 = math.exp %136 : vector<2x32xf32>
    %cst_38 = arith.constant 1.000000e+00 : f32
    %138 = vector.broadcast %cst_38 : f32 to vector<2x32xf32>
    %139 = arith.addf %138, %137 : vector<2x32xf32>
    %140 = arith.divf %138, %139 : vector<2x32xf32>
    %141 = vector.extract_strided_slice %134 {offsets = [0, 32], sizes = [2, 32], strides = [1, 1]} : vector<2x128xf32> to vector<2x32xf32>
    %142 = arith.negf %141 : vector<2x32xf32>
    %143 = math.exp %142 : vector<2x32xf32>
    %cst_39 = arith.constant 1.000000e+00 : f32
    %144 = vector.broadcast %cst_39 : f32 to vector<2x32xf32>
    %145 = arith.addf %144, %143 : vector<2x32xf32>
    %146 = arith.divf %144, %145 : vector<2x32xf32>
    %147 = vector.extract_strided_slice %134 {offsets = [0, 64], sizes = [2, 32], strides = [1, 1]} : vector<2x128xf32> to vector<2x32xf32>
    %148 = math.tanh %147 : vector<2x32xf32>
    %149 = vector.extract_strided_slice %134 {offsets = [0, 96], sizes = [2, 32], strides = [1, 1]} : vector<2x128xf32> to vector<2x32xf32>
    %150 = arith.negf %149 : vector<2x32xf32>
    %151 = math.exp %150 : vector<2x32xf32>
    %cst_40 = arith.constant 1.000000e+00 : f32
    %152 = vector.broadcast %cst_40 : f32 to vector<2x32xf32>
    %153 = arith.addf %152, %151 : vector<2x32xf32>
    %154 = arith.divf %152, %153 : vector<2x32xf32>
    %155 = arith.mulf %146, %127 : vector<2x32xf32>
    %156 = arith.mulf %140, %148 : vector<2x32xf32>
    %157 = arith.addf %155, %156 : vector<2x32xf32>
    %158 = math.tanh %157 : vector<2x32xf32>
    %159 = arith.mulf %154, %158 : vector<2x32xf32>
    %c5_i32 = arith.constant 5 : i32
    %c2_i32_41 = arith.constant 2 : i32
    %160 = arith.muli %c5_i32, %c2_i32_41 : i32
    %161 = arith.index_cast %160 : i32 to index
    %c0_42 = arith.constant 0 : index
    %162 = vector.load %arg7[%161, %c0_42] : memref<16x128xf32, #tpu.memory_space<vmem>>, vector<2x128xf32>
    %cst_43 = arith.constant dense<0.000000e+00> : vector<2x128xf32>
    %163 = tpu.matmul %159, %7, %cst_43 {dimension_numbers = #tpu.dot_dimension_numbers<[1], [0], [0], [1], [0, 0, 1, 1], [], []>} : vector<2x32xf32>, vector<32x128xf32>, vector<2x128xf32> -> vector<2x128xf32>
    %164 = arith.addf %162, %163 : vector<2x128xf32>
    %165 = vector.extract_strided_slice %164 {offsets = [0, 0], sizes = [2, 32], strides = [1, 1]} : vector<2x128xf32> to vector<2x32xf32>
    %166 = arith.negf %165 : vector<2x32xf32>
    %167 = math.exp %166 : vector<2x32xf32>
    %cst_44 = arith.constant 1.000000e+00 : f32
    %168 = vector.broadcast %cst_44 : f32 to vector<2x32xf32>
    %169 = arith.addf %168, %167 : vector<2x32xf32>
    %170 = arith.divf %168, %169 : vector<2x32xf32>
    %171 = vector.extract_strided_slice %164 {offsets = [0, 32], sizes = [2, 32], strides = [1, 1]} : vector<2x128xf32> to vector<2x32xf32>
    %172 = arith.negf %171 : vector<2x32xf32>
    %173 = math.exp %172 : vector<2x32xf32>
    %cst_45 = arith.constant 1.000000e+00 : f32
    %174 = vector.broadcast %cst_45 : f32 to vector<2x32xf32>
    %175 = arith.addf %174, %173 : vector<2x32xf32>
    %176 = arith.divf %174, %175 : vector<2x32xf32>
    %177 = vector.extract_strided_slice %164 {offsets = [0, 64], sizes = [2, 32], strides = [1, 1]} : vector<2x128xf32> to vector<2x32xf32>
    %178 = math.tanh %177 : vector<2x32xf32>
    %179 = vector.extract_strided_slice %164 {offsets = [0, 96], sizes = [2, 32], strides = [1, 1]} : vector<2x128xf32> to vector<2x32xf32>
    %180 = arith.negf %179 : vector<2x32xf32>
    %181 = math.exp %180 : vector<2x32xf32>
    %cst_46 = arith.constant 1.000000e+00 : f32
    %182 = vector.broadcast %cst_46 : f32 to vector<2x32xf32>
    %183 = arith.addf %182, %181 : vector<2x32xf32>
    %184 = arith.divf %182, %183 : vector<2x32xf32>
    %185 = arith.mulf %176, %157 : vector<2x32xf32>
    %186 = arith.mulf %170, %178 : vector<2x32xf32>
    %187 = arith.addf %185, %186 : vector<2x32xf32>
    %188 = math.tanh %187 : vector<2x32xf32>
    %189 = arith.mulf %184, %188 : vector<2x32xf32>
    %c6_i32 = arith.constant 6 : i32
    %c2_i32_47 = arith.constant 2 : i32
    %190 = arith.muli %c6_i32, %c2_i32_47 : i32
    %191 = arith.index_cast %190 : i32 to index
    %c0_48 = arith.constant 0 : index
    %192 = vector.load %arg7[%191, %c0_48] : memref<16x128xf32, #tpu.memory_space<vmem>>, vector<2x128xf32>
    %cst_49 = arith.constant dense<0.000000e+00> : vector<2x128xf32>
    %193 = tpu.matmul %189, %7, %cst_49 {dimension_numbers = #tpu.dot_dimension_numbers<[1], [0], [0], [1], [0, 0, 1, 1], [], []>} : vector<2x32xf32>, vector<32x128xf32>, vector<2x128xf32> -> vector<2x128xf32>
    %194 = arith.addf %192, %193 : vector<2x128xf32>
    %195 = vector.extract_strided_slice %194 {offsets = [0, 0], sizes = [2, 32], strides = [1, 1]} : vector<2x128xf32> to vector<2x32xf32>
    %196 = arith.negf %195 : vector<2x32xf32>
    %197 = math.exp %196 : vector<2x32xf32>
    %cst_50 = arith.constant 1.000000e+00 : f32
    %198 = vector.broadcast %cst_50 : f32 to vector<2x32xf32>
    %199 = arith.addf %198, %197 : vector<2x32xf32>
    %200 = arith.divf %198, %199 : vector<2x32xf32>
    %201 = vector.extract_strided_slice %194 {offsets = [0, 32], sizes = [2, 32], strides = [1, 1]} : vector<2x128xf32> to vector<2x32xf32>
    %202 = arith.negf %201 : vector<2x32xf32>
    %203 = math.exp %202 : vector<2x32xf32>
    %cst_51 = arith.constant 1.000000e+00 : f32
    %204 = vector.broadcast %cst_51 : f32 to vector<2x32xf32>
    %205 = arith.addf %204, %203 : vector<2x32xf32>
    %206 = arith.divf %204, %205 : vector<2x32xf32>
    %207 = vector.extract_strided_slice %194 {offsets = [0, 64], sizes = [2, 32], strides = [1, 1]} : vector<2x128xf32> to vector<2x32xf32>
    %208 = math.tanh %207 : vector<2x32xf32>
    %209 = vector.extract_strided_slice %194 {offsets = [0, 96], sizes = [2, 32], strides = [1, 1]} : vector<2x128xf32> to vector<2x32xf32>
    %210 = arith.negf %209 : vector<2x32xf32>
    %211 = math.exp %210 : vector<2x32xf32>
    %cst_52 = arith.constant 1.000000e+00 : f32
    %212 = vector.broadcast %cst_52 : f32 to vector<2x32xf32>
    %213 = arith.addf %212, %211 : vector<2x32xf32>
    %214 = arith.divf %212, %213 : vector<2x32xf32>
    %215 = arith.mulf %206, %187 : vector<2x32xf32>
    %216 = arith.mulf %200, %208 : vector<2x32xf32>
    %217 = arith.addf %215, %216 : vector<2x32xf32>
    %218 = math.tanh %217 : vector<2x32xf32>
    %219 = arith.mulf %214, %218 : vector<2x32xf32>
    %c7_i32 = arith.constant 7 : i32
    %c2_i32_53 = arith.constant 2 : i32
    %220 = arith.muli %c7_i32, %c2_i32_53 : i32
    %221 = arith.index_cast %220 : i32 to index
    %c0_54 = arith.constant 0 : index
    %222 = vector.load %arg7[%221, %c0_54] : memref<16x128xf32, #tpu.memory_space<vmem>>, vector<2x128xf32>
    %cst_55 = arith.constant dense<0.000000e+00> : vector<2x128xf32>
    %223 = tpu.matmul %219, %7, %cst_55 {dimension_numbers = #tpu.dot_dimension_numbers<[1], [0], [0], [1], [0, 0, 1, 1], [], []>} : vector<2x32xf32>, vector<32x128xf32>, vector<2x128xf32> -> vector<2x128xf32>
    %224 = arith.addf %222, %223 : vector<2x128xf32>
    %225 = vector.extract_strided_slice %224 {offsets = [0, 0], sizes = [2, 32], strides = [1, 1]} : vector<2x128xf32> to vector<2x32xf32>
    %226 = arith.negf %225 : vector<2x32xf32>
    %227 = math.exp %226 : vector<2x32xf32>
    %cst_56 = arith.constant 1.000000e+00 : f32
    %228 = vector.broadcast %cst_56 : f32 to vector<2x32xf32>
    %229 = arith.addf %228, %227 : vector<2x32xf32>
    %230 = arith.divf %228, %229 : vector<2x32xf32>
    %231 = vector.extract_strided_slice %224 {offsets = [0, 32], sizes = [2, 32], strides = [1, 1]} : vector<2x128xf32> to vector<2x32xf32>
    %232 = arith.negf %231 : vector<2x32xf32>
    %233 = math.exp %232 : vector<2x32xf32>
    %cst_57 = arith.constant 1.000000e+00 : f32
    %234 = vector.broadcast %cst_57 : f32 to vector<2x32xf32>
    %235 = arith.addf %234, %233 : vector<2x32xf32>
    %236 = arith.divf %234, %235 : vector<2x32xf32>
    %237 = vector.extract_strided_slice %224 {offsets = [0, 64], sizes = [2, 32], strides = [1, 1]} : vector<2x128xf32> to vector<2x32xf32>
    %238 = math.tanh %237 : vector<2x32xf32>
    %239 = vector.extract_strided_slice %224 {offsets = [0, 96], sizes = [2, 32], strides = [1, 1]} : vector<2x128xf32> to vector<2x32xf32>
    %240 = arith.negf %239 : vector<2x32xf32>
    %241 = math.exp %240 : vector<2x32xf32>
    %cst_58 = arith.constant 1.000000e+00 : f32
    %242 = vector.broadcast %cst_58 : f32 to vector<2x32xf32>
    %243 = arith.addf %242, %241 : vector<2x32xf32>
    %244 = arith.divf %242, %243 : vector<2x32xf32>
    %245 = arith.mulf %236, %217 : vector<2x32xf32>
    %246 = arith.mulf %230, %238 : vector<2x32xf32>
    %247 = arith.addf %245, %246 : vector<2x32xf32>
    %248 = math.tanh %247 : vector<2x32xf32>
    %249 = arith.mulf %244, %248 : vector<2x32xf32>
    %c8_i32 = arith.constant 8 : i32
    %c0_59 = arith.constant 0 : index
    %c0_60 = arith.constant 0 : index
    %250 = vector.load %arg4[%c0_59, %c0_60] : memref<32x1xf32, #tpu.memory_space<vmem>>, vector<32x1xf32>
    %cst_61 = arith.constant dense<0.000000e+00> : vector<2x1xf32>
    %251 = tpu.matmul %249, %250, %cst_61 {dimension_numbers = #tpu.dot_dimension_numbers<[1], [0], [0], [1], [0, 0, 1, 1], [], []>} : vector<2x32xf32>, vector<32x1xf32>, vector<2x1xf32> -> vector<2x1xf32>
    %c0_62 = arith.constant 0 : index
    %c0_63 = arith.constant 0 : index
    %252 = vector.load %arg5[%c0_62, %c0_63] : memref<1x1xf32, #tpu.memory_space<vmem>>, vector<1x1xf32>
    %253 = vector.broadcast %252 : vector<1x1xf32> to vector<2x1xf32>
    %254 = arith.addf %251, %253 : vector<2x1xf32>
    %c0_64 = arith.constant 0 : index
    %c0_65 = arith.constant 0 : index
    %255 = vector.load %arg6[%c0_64, %c0_65] : memref<2x1xf32, #tpu.memory_space<vmem>>, vector<2x1xf32>
    tpu.vector_store %arg6[%c0_64, %c0_65], %254 {strides = array<i32>} : memref<2x1xf32, #tpu.memory_space<vmem>>, vector<2x1xf32>,
    return
  }
}

</mosaic_0001>

<bundles_post_ra>
// kernel: lstm_model_forward.1
= control target key start
LH: loop header
LB: loop body
LE: loop exit
PB: predicated region body
PF: predicated region fallthrough
CT: control target
= control target key end

     0   :  { %vm39_vm0 = vcmask 1043456   ;;  %vm32_vm1 = vcmask 31744   ;;  %v710_v6 = vmov 0.0   ;;  %s711_s9 = smov 64   ;;  %vm73_vm6 = vcmask 261120   ;;  %s836_s1 = inlined_call_operand.vmem [shape: f32[4,128], index: 1, kind: input, shape index: {}]   ;;  %s837_s0 = inlined_call_operand.vmem [shape: f32[16,4], index: 0, kind: input, shape index: {}]   ;;  %s838_s2 = inlined_call_operand.vmem [shape: f32[32,128], index: 2, kind: input, shape index: {}]   ;;  %s839_s3 = inlined_call_operand.vmem [shape: f32[1,128], index: 3, kind: input, shape index: {}]   ;;  %s840_s4 = inlined_call_operand.vmem [shape: f32[32,1], index: 4, kind: input, shape index: {}]   ;;  %s841_s5 = inlined_call_operand.<no memory space> [shape: f32[1,1], index: 5, kind: input, shape index: {}]   ;;  %s842_s6 = inlined_call_operand.vmem [shape: f32[2,1], index: 6, kind: output, shape index: {}]  }
   0x1   :  { %v27_v0 = vld [vmem:[%s836_s1] sm:$0xf]  ;;  %v71_v2 = vld [vmem:[%s838_s2 + $0x18] sm:$0xff]  ;;  %v70_v3 = vld [vmem:[%s838_s2 + $0x10] sm:$0xff] }
   0x2   :  { %v25_v1 = vld [vmem:[%s837_s0] sm:$0xff]  ;;  %622 = vmatpush.msk.msra.mxu0 %vm39_vm0, %v27_v0  ;;  %89 = vmatpush.msra.mxu1 %v71_v2  ;;  %v69_v4 = vld [vmem:[%s838_s2 + $0x8] sm:$0xff] }
   0x3   :  { %623 = vmatmul.msk.f32.vlgmr.msra.gmra.mxu0 %vm32_vm1, %v25_v1  ;;  %153 = vmatpush.msra.mxu2 %v71_v2  ;;  %v68_v5 = vld [vmem:[%s838_s2] sm:$0xff] }
   0x4   :  { %90 = vmatpush.msra.mxu1 %v70_v3  ;;  %217 = vmatpush.msra.mxu3 %v71_v2  ;;  %v770_v7 = vld [vmem:[%s839_s3] ss:$0 sm:$0xff]  ;;  %s712_s3 = smov 32  }
   0x5   :  { %154 = vmatpush.msra.mxu2 %v70_v3  ;;  %473 = vmatpush.msrb.mxu0 %v71_v2 }
   0x6   :  { %91 = vmatpush.msra.mxu1 %v69_v4  ;;  %218 = vmatpush.msra.mxu3 %v70_v3 }
   0x7   :  { %155 = vmatpush.msra.mxu2 %v69_v4  ;;  %474 = vmatpush.msrb.mxu0 %v70_v3 }
   0x8   :  { %92 = vmatpush.msra.mxu1 %v68_v5  ;;  %219 = vmatpush.msra.mxu3 %v69_v4 }
   0x9   :  { %93 = vmatmul.f32.vlgmr.msra.gmra.mxu1 %v710_v6  ;;  %156 = vmatpush.msra.mxu2 %v68_v5 }
   0xa   :  { %220 = vmatpush.msra.mxu3 %v68_v5  ;;  %281 = vmatpush.msrb.mxu1 %v71_v2 }
   0xb   :  { %345 = vmatpush.msrb.mxu2 %v71_v2  ;;  %475 = vmatpush.msrb.mxu0 %v69_v4 }
   0xc   :  { %409 = vmatpush.msrb.mxu3 %v71_v2  ;;  %282 = vmatpush.msrb.mxu1 %v70_v3 }
   0xd   :  { %346 = vmatpush.msrb.mxu2 %v70_v3  ;;  %476 = vmatpush.msrb.mxu0 %v68_v5 }
   0xe   :  { %410 = vmatpush.msrb.mxu3 %v70_v3  ;;  %283 = vmatpush.msrb.mxu1 %v69_v4 }
   0xf   :  { %347 = vmatpush.msrb.mxu2 %v69_v4 }
  0x10   :  { %411 = vmatpush.msrb.mxu3 %v69_v4  ;;  %284 = vmatpush.msrb.mxu1 %v68_v5 }
  0x11   :  { %348 = vmatpush.msrb.mxu2 %v68_v5 }
  0x12   :  { %412 = vmatpush.msrb.mxu3 %v68_v5  ;;  %537 = vmatpush.msra.mxu1 %v71_v2 }
  0x14   :  { %538 = vmatpush.msra.mxu1 %v70_v3 }
  0x16   :  { %539 = vmatpush.msra.mxu1 %v69_v4 }
  0x18   :  { %540 = vmatpush.msra.mxu1 %v68_v5 }
  0x80   :  { %v60_v8 = vpop.f32.mrf.mxu0 }
  0x81   :  { %v61_v9 = vadd.f32 %v770_v7, %v60_v8 }
  0x83   :  { %66 = vst [vmem:[#allocation2] sm:$0xff] %v61_v9 }
  0x86   :  { %v94_v10 = vpop.f32.mrf.mxu1 }
  0x8a   :  { %v72_v11 = vld [vmem:[#allocation2] sm:$0x3]  ;;  %v135_v36 = vld [vmem:[#allocation2 + $0x2] sm:$0x3]  ;;  %v199_v62 = vld [vmem:[#allocation2 + $0x4] sm:$0x3] }
  0x8b   :  { %v97_v12 = vadd.f32 %v94_v10, %v72_v11 }
  0x8d   :  { %646 = vtanh.f32 %v97_v12  ;;  %v625_v14 = vmul.f32 -1.442695, %v97_v12 }
  0x8f   :  { %648 = vpow2.f32 %v625_v14 }
  0x93   :  { %v647_v13 = vpop.eup %646 }
  0x94   :  { %120 = vrot.lane.b32.xlu0 %v647_v13, %s711_s9 }
  0x95   :  { %v649_v15 = vpop.eup %648 }
  0x96   :  { %v101_v16 = vadd.f32 1.0, %v649_v15 }
  0x98   :  { %650 = vrcp.f32 %v101_v16  ;;  %v113_v22 = vand.u32 2147483648, %v101_v16  ;;  %vm107_vm3 = vweird.f32 %v101_v16  ;;  %v111_v23 = vand.u32 2147483647, %v101_v16 }
  0x9a   :  { %v114_v25 = vor.u32 1.1754944e-38, %v113_v22  ;;  %vm112_vm5 = vcmp.eq.f32.partialorder %v111_v23, 8.507059e+37 }
  0x9e   :  { %v651_v17 = vpop.eup %650 }
  0x9f   :  { %v103_v18 = vmul.f32 %v651_v17, %v101_v16  ;;  %vm108_vm2 = vweird.f32 %v651_v17 }
  0xa0   :  { %vm109_vm4 = vmor %vm107_vm3, %vm108_vm2 }
  0xa1   :  { %v104_v19 = vsub.f32 1.0, %v103_v18 }
  0xa3   :  { %v105_v20 = vmul.f32 %v651_v17, %v104_v19 }
  0xa5   :  { %v106_v21 = vadd.f32 %v651_v17, %v105_v20 }
  0xa7   :  { %v110_v24 = vsel %vm109_vm4, %v651_v17, %v106_v21 }
  0xa8   :  { %v115_v27 = vsel %vm112_vm5, %v114_v25, %v110_v24  ;;  %v263_v25 = vld [vmem:[#allocation2 + $0x6] sm:$0x3] }
  0xa9   :  { %v118_v29 = vmul.f32 0.0, %v115_v27 }
 0x106   :  { %v121_v26 = vpop.permute.xlu0 %120 }
 0x107   :  { %v123_v28 = vmul.f32 %v121_v26, %v115_v27 }
 0x109   :  { %125 = vrot.lane.b32.xlu0 %v123_v28, %s712_s3 }
 0x17b   :  { %v126_v30 = vpop.permute.xlu0 %125 }
 0x17c   :  { %v128_v31 = vadd.f32 %v126_v30, %v118_v29 }
 0x17e   :  { %652 = vtanh.f32 %v128_v31 }
 0x184   :  { %v653_v32 = vpop.eup %652 }
 0x185   :  { %131 = vrot.lane.b32.xlu1 %v653_v32, %s711_s9 }
 0x1f7   :  { %v132_v33 = vpop.permute.xlu1 %131 }
 0x1f8   :  { %v134_v34 = vmul.f32 %v132_v33, %v115_v27 }
 0x1fa   :  { %137 = vrot.lane.b32.xlu1 %v134_v34, %s712_s3 }
 0x26c   :  { %v138_v35 = vpop.permute.xlu1 %137 }
 0x26d   :  { %626 = vmatmul.msk.f32.vlgmr.msra.gmra.mxu2 %vm73_vm6, %v138_v35 }
 0x2f0   :  { %v158_v37 = vpop.f32.mrf.mxu2 }
 0x2f1   :  { %v161_v38 = vadd.f32 %v158_v37, %v135_v36 }
 0x2f3   :  { %654 = vtanh.f32 %v161_v38  ;;  %v627_v40 = vmul.f32 -1.442695, %v161_v38 }
 0x2f5   :  { %656 = vpow2.f32 %v627_v40 }
 0x2f9   :  { %v655_v39 = vpop.eup %654 }
 0x2fa   :  { %184 = vrot.lane.b32.xlu2 %v655_v39, %s711_s9 }
 0x2fb   :  { %v657_v41 = vpop.eup %656 }
 0x2fc   :  { %v165_v42 = vadd.f32 1.0, %v657_v41 }
 0x2fe   :  { %658 = vrcp.f32 %v165_v42  ;;  %v177_v48 = vand.u32 2147483648, %v165_v42  ;;  %vm171_vm8 = vweird.f32 %v165_v42  ;;  %v175_v49 = vand.u32 2147483647, %v165_v42 }
 0x300   :  { %v178_v51 = vor.u32 1.1754944e-38, %v177_v48  ;;  %vm176_vm10 = vcmp.eq.f32.partialorder %v175_v49, 8.507059e+37  ;;  %v26_v48 = vld [vmem:[%s837_s0 + $0x8] sm:$0xff] }
 0x301   :  { %624 = vmatmul.msk.f32.gmra.mxu0 %vm32_vm1, %v26_v48 }
 0x304   :  { %v659_v43 = vpop.eup %658 }
 0x305   :  { %v167_v44 = vmul.f32 %v659_v43, %v165_v42  ;;  %vm172_vm7 = vweird.f32 %v659_v43 }
 0x306   :  { %vm173_vm9 = vmor %vm171_vm8, %vm172_vm7 }
 0x307   :  { %v168_v45 = vsub.f32 1.0, %v167_v44 }
 0x309   :  { %v169_v46 = vmul.f32 %v659_v43, %v168_v45 }
 0x30b   :  { %v170_v47 = vadd.f32 %v659_v43, %v169_v46 }
 0x30d   :  { %v174_v50 = vsel %vm173_vm9, %v659_v43, %v170_v47 }
 0x30e   :  { %v179_v53 = vsel %vm176_vm10, %v178_v51, %v174_v50 }
 0x30f   :  { %v182_v55 = vmul.f32 %v179_v53, %v128_v31 }
 0x354   :  { %v185_v52 = vpop.permute.xlu2 %184 }
 0x355   :  { %v187_v54 = vmul.f32 %v185_v52, %v179_v53 }
 0x357   :  { %189 = vrot.lane.b32.xlu2 %v187_v54, %s712_s3 }
 0x37e   :  { %v63_v51 = vpop.f32.mrf.mxu0 }
 0x37f   :  { %v64_v52 = vadd.f32 %v770_v7, %v63_v51 }
 0x381   :  { %67 = vst [vmem:[#allocation2 + $0x8] sm:$0xff] %v64_v52 }
 0x388   :  { %v327_v54 = vld [vmem:[#allocation2 + $0x8] sm:$0x3] }
 0x3b1   :  { %v190_v56 = vpop.permute.xlu2 %189 }
 0x3b2   :  { %v192_v57 = vadd.f32 %v190_v56, %v182_v55 }
 0x3b4   :  { %660 = vtanh.f32 %v192_v57 }
 0x3ba   :  { %v661_v58 = vpop.eup %660 }
 0x3bb   :  { %195 = vrot.lane.b32.xlu0 %v661_v58, %s711_s9 }
 0x42d   :  { %v196_v59 = vpop.permute.xlu0 %195 }
 0x42e   :  { %v198_v60 = vmul.f32 %v196_v59, %v179_v53 }
 0x430   :  { %201 = vrot.lane.b32.xlu1 %v198_v60, %s712_s3 }
 0x4a2   :  { %v202_v61 = vpop.permute.xlu1 %201 }
 0x4a3   :  { %628 = vmatmul.msk.f32.vlgmr.msra.gmra.mxu3 %vm73_vm6, %v202_v61 }
 0x526   :  { %v222_v63 = vpop.f32.mrf.mxu3 }
 0x527   :  { %v225_v0 = vadd.f32 %v222_v63, %v199_v62 }
 0x529   :  { %662 = vtanh.f32 %v225_v0  ;;  %v629_v2 = vmul.f32 -1.442695, %v225_v0 }
 0x52b   :  { %664 = vpow2.f32 %v629_v2 }
 0x52f   :  { %v663_v1 = vpop.eup %662 }
 0x530   :  { %248 = vrot.lane.b32.xlu2 %v663_v1, %s711_s9 }
 0x531   :  { %v665_v3 = vpop.eup %664 }
 0x532   :  { %v229_v4 = vadd.f32 1.0, %v665_v3 }
 0x534   :  { %666 = vrcp.f32 %v229_v4  ;;  %v241_v11 = vand.u32 2147483648, %v229_v4  ;;  %vm235_vm12 = vweird.f32 %v229_v4  ;;  %v239_v12 = vand.u32 2147483647, %v229_v4 }
 0x536   :  { %v242_v14 = vor.u32 1.1754944e-38, %v241_v11  ;;  %vm240_vm14 = vcmp.eq.f32.partialorder %v239_v12, 8.507059e+37 }
 0x53a   :  { %v667_v5 = vpop.eup %666 }
 0x53b   :  { %v231_v6 = vmul.f32 %v667_v5, %v229_v4  ;;  %vm236_vm11 = vweird.f32 %v667_v5 }
 0x53c   :  { %vm237_vm13 = vmor %vm235_vm12, %vm236_vm11 }
 0x53d   :  { %v232_v8 = vsub.f32 1.0, %v231_v6 }
 0x53f   :  { %v233_v9 = vmul.f32 %v667_v5, %v232_v8 }
 0x541   :  { %v234_v10 = vadd.f32 %v667_v5, %v233_v9 }
 0x543   :  { %v238_v13 = vsel %vm237_vm13, %v667_v5, %v234_v10 }
 0x544   :  { %v243_v16 = vsel %vm240_vm14, %v242_v14, %v238_v13 }
 0x545   :  { %v246_v18 = vmul.f32 %v243_v16, %v192_v57 }
 0x58a   :  { %v249_v15 = vpop.permute.xlu2 %248 }
 0x58b   :  { %v251_v17 = vmul.f32 %v249_v15, %v243_v16 }
 0x58d   :  { %253 = vrot.lane.b32.xlu0 %v251_v17, %s712_s3 }
 0x5ff   :  { %v254_v19 = vpop.permute.xlu0 %253 }
 0x600   :  { %v256_v20 = vadd.f32 %v254_v19, %v246_v18 }
 0x602   :  { %668 = vtanh.f32 %v256_v20 }
 0x608   :  { %v669_v21 = vpop.eup %668 }
 0x609   :  { %259 = vrot.lane.b32.xlu1 %v669_v21, %s711_s9 }
 0x67b   :  { %v260_v22 = vpop.permute.xlu1 %259 }
 0x67c   :  { %v262_v23 = vmul.f32 %v260_v22, %v243_v16  ;;  %v391_v16 = vld [vmem:[#allocation2 + $0xa] sm:$0x3] }
 0x67e   :  { %265 = vrot.lane.b32.xlu2 %v262_v23, %s712_s3 }
 0x6d8   :  { %v266_v24 = vpop.permute.xlu2 %265 }
 0x6d9   :  { %630 = vmatmul.msk.f32.vlgmr.msrb.gmra.mxu1 %vm73_vm6, %v266_v24 }
 0x756   :  { %v286_v26 = vpop.f32.mrf.mxu1 }
 0x757   :  { %v289_v27 = vadd.f32 %v286_v26, %v263_v25 }
 0x759   :  { %670 = vtanh.f32 %v289_v27  ;;  %v631_v29 = vmul.f32 -1.442695, %v289_v27 }
 0x75b   :  { %672 = vpow2.f32 %v631_v29 }
 0x75f   :  { %v671_v28 = vpop.eup %670 }
 0x760   :  { %312 = vrot.lane.b32.xlu0 %v671_v28, %s711_s9 }
 0x761   :  { %v673_v30 = vpop.eup %672 }
 0x762   :  { %v293_v31 = vadd.f32 1.0, %v673_v30 }
 0x764   :  { %674 = vrcp.f32 %v293_v31  ;;  %v305_v37 = vand.u32 2147483648, %v293_v31  ;;  %vm299_vm0 = vweird.f32 %v293_v31  ;;  %v303_v38 = vand.u32 2147483647, %v293_v31 }
 0x766   :  { %v306_v40 = vor.u32 1.1754944e-38, %v305_v37  ;;  %vm304_vm3 = vcmp.eq.f32.partialorder %v303_v38, 8.507059e+37 }
 0x76a   :  { %v675_v32 = vpop.eup %674 }
 0x76b   :  { %v295_v33 = vmul.f32 %v675_v32, %v293_v31  ;;  %vm300_vm15 = vweird.f32 %v675_v32 }
 0x76c   :  { %vm301_vm2 = vmor %vm299_vm0, %vm300_vm15 }
 0x76d   :  { %v296_v34 = vsub.f32 1.0, %v295_v33 }
 0x76f   :  { %v297_v35 = vmul.f32 %v675_v32, %v296_v34 }
 0x771   :  { %v298_v36 = vadd.f32 %v675_v32, %v297_v35 }
 0x773   :  { %v302_v39 = vsel %vm301_vm2, %v675_v32, %v298_v36 }
 0x774   :  { %v307_v42 = vsel %vm304_vm3, %v306_v40, %v302_v39 }
 0x775   :  { %v310_v44 = vmul.f32 %v307_v42, %v256_v20 }
 0x7d2   :  { %v313_v41 = vpop.permute.xlu0 %312 }
 0x7d3   :  { %v315_v43 = vmul.f32 %v313_v41, %v307_v42 }
 0x7d5   :  { %317 = vrot.lane.b32.xlu1 %v315_v43, %s712_s3 }
 0x847   :  { %v318_v45 = vpop.permute.xlu1 %317 }
 0x848   :  { %v320_v46 = vadd.f32 %v318_v45, %v310_v44 }
 0x84a   :  { %676 = vtanh.f32 %v320_v46 }
 0x850   :  { %v677_v47 = vpop.eup %676 }
 0x851   :  { %323 = vrot.lane.b32.xlu2 %v677_v47, %s711_s9 }
 0x8ab   :  { %v324_v49 = vpop.permute.xlu2 %323 }
 0x8ac   :  { %v326_v50 = vmul.f32 %v324_v49, %v307_v42  ;;  %v455_v42 = vld [vmem:[#allocation2 + $0xc] sm:$0x3] }
 0x8ae   :  { %329 = vrot.lane.b32.xlu0 %v326_v50, %s712_s3 }
 0x920   :  { %v330_v53 = vpop.permute.xlu0 %329 }
 0x921   :  { %632 = vmatmul.msk.f32.vlgmr.msrb.gmra.mxu2 %vm73_vm6, %v330_v53 }
 0x9a4   :  { %v350_v55 = vpop.f32.mrf.mxu2 }
 0x9a5   :  { %v353_v56 = vadd.f32 %v350_v55, %v327_v54 }
 0x9a7   :  { %678 = vtanh.f32 %v353_v56  ;;  %v633_v58 = vmul.f32 -1.442695, %v353_v56 }
 0x9a9   :  { %680 = vpow2.f32 %v633_v58 }
 0x9ad   :  { %v679_v57 = vpop.eup %678 }
 0x9ae   :  { %376 = vrot.lane.b32.xlu1 %v679_v57, %s711_s9 }
 0x9af   :  { %v681_v59 = vpop.eup %680 }
 0x9b0   :  { %v357_v60 = vadd.f32 1.0, %v681_v59 }
 0x9b2   :  { %682 = vrcp.f32 %v357_v60  ;;  %v369_v1 = vand.u32 2147483648, %v357_v60  ;;  %vm363_vm4 = vweird.f32 %v357_v60  ;;  %v367_v2 = vand.u32 2147483647, %v357_v60 }
 0x9b4   :  { %v370_v4 = vor.u32 1.1754944e-38, %v369_v1  ;;  %vm368_vm7 = vcmp.eq.f32.partialorder %v367_v2, 8.507059e+37 }
 0x9b8   :  { %v683_v61 = vpop.eup %682 }
 0x9b9   :  { %v359_v62 = vmul.f32 %v683_v61, %v357_v60  ;;  %vm364_vm1 = vweird.f32 %v683_v61 }
 0x9ba   :  { %vm365_vm5 = vmor %vm363_vm4, %vm364_vm1  ;;  %vm616_vm4 = vcmask 1024  }
 0x9bb   :  { %v360_v63 = vsub.f32 1.0, %v359_v62 }
 0x9bd   :  { %v361_v7 = vmul.f32 %v683_v61, %v360_v63 }
 0x9bf   :  { %v362_v0 = vadd.f32 %v683_v61, %v361_v7 }
 0x9c1   :  { %v366_v3 = vsel %vm365_vm5, %v683_v61, %v362_v0 }
 0x9c2   :  { %v371_v6 = vsel %vm368_vm7, %v370_v4, %v366_v3  ;;  %v519_v3 = vld [vmem:[#allocation2 + $0xe] sm:$0x3] }
 0x9c3   :  { %v374_v9 = vmul.f32 %v371_v6, %v320_v46 }
 0xa20   :  { %v377_v5 = vpop.permute.xlu1 %376 }
 0xa21   :  { %v379_v8 = vmul.f32 %v377_v5, %v371_v6 }
 0xa23   :  { %381 = vrot.lane.b32.xlu2 %v379_v8, %s712_s3 }
 0xa7d   :  { %v382_v10 = vpop.permute.xlu2 %381 }
 0xa7e   :  { %v384_v11 = vadd.f32 %v382_v10, %v374_v9 }
 0xa80   :  { %684 = vtanh.f32 %v384_v11 }
 0xa86   :  { %v685_v12 = vpop.eup %684 }
 0xa87   :  { %387 = vrot.lane.b32.xlu0 %v685_v12, %s711_s9 }
 0xaf9   :  { %v388_v13 = vpop.permute.xlu0 %387 }
 0xafa   :  { %v390_v14 = vmul.f32 %v388_v13, %v371_v6 }
 0xafc   :  { %393 = vrot.lane.b32.xlu1 %v390_v14, %s712_s3 }
 0xb6e   :  { %v394_v15 = vpop.permute.xlu1 %393 }
 0xb6f   :  { %634 = vmatmul.msk.f32.vlgmr.msrb.gmra.mxu3 %vm73_vm6, %v394_v15 }
 0xbf2   :  { %v414_v17 = vpop.f32.mrf.mxu3 }
 0xbf3   :  { %v417_v18 = vadd.f32 %v414_v17, %v391_v16 }
 0xbf5   :  { %686 = vtanh.f32 %v417_v18  ;;  %v635_v20 = vmul.f32 -1.442695, %v417_v18 }
 0xbf7   :  { %688 = vpow2.f32 %v635_v20 }
 0xbfb   :  { %v687_v19 = vpop.eup %686 }
 0xbfc   :  { %440 = vrot.lane.b32.xlu2 %v687_v19, %s711_s9 }
 0xbfd   :  { %v689_v21 = vpop.eup %688 }
 0xbfe   :  { %v421_v22 = vadd.f32 1.0, %v689_v21 }
 0xc00   :  { %690 = vrcp.f32 %v421_v22  ;;  %v433_v28 = vand.u32 2147483648, %v421_v22  ;;  %vm427_vm9 = vweird.f32 %v421_v22  ;;  %v431_v29 = vand.u32 2147483647, %v421_v22 }
 0xc02   :  { %v434_v31 = vor.u32 1.1754944e-38, %v433_v28  ;;  %vm432_vm11 = vcmp.eq.f32.partialorder %v431_v29, 8.507059e+37  ;;  %v585_v28 = vld [vmem:[%s840_s4 + $0x10] sm:$0xff]  ;;  %v584_v29 = vld [vmem:[%s840_s4 + $0x8] sm:$0xff] }
 0xc06   :  { %v691_v23 = vpop.eup %690 }
 0xc07   :  { %v423_v24 = vmul.f32 %v691_v23, %v421_v22  ;;  %vm428_vm8 = vweird.f32 %v691_v23 }
 0xc08   :  { %vm429_vm10 = vmor %vm427_vm9, %vm428_vm8 }
 0xc09   :  { %v424_v25 = vsub.f32 1.0, %v423_v24 }
 0xc0b   :  { %v425_v26 = vmul.f32 %v691_v23, %v424_v25 }
 0xc0d   :  { %v426_v27 = vadd.f32 %v691_v23, %v425_v26 }
 0xc0f   :  { %v430_v30 = vsel %vm429_vm10, %v691_v23, %v426_v27  ;;  %v586_v27 = vld [vmem:[%s840_s4 + $0x18] sm:$0xff] }
 0xc10   :  { %v435_v33 = vsel %vm432_vm11, %v434_v31, %v430_v30  ;;  %608 = vmatpush.msra.mxu2 %v586_v27  ;;  %v583_v30 = vld [vmem:[%s840_s4] sm:$0xff] }
 0xc11   :  { %v438_v35 = vmul.f32 %v435_v33, %v384_v11 }
 0xc12   :  { %609 = vmatpush.msra.mxu2 %v585_v28 }
 0xc14   :  { %610 = vmatpush.msra.mxu2 %v584_v29 }
 0xc16   :  { %611 = vmatpush.msra.mxu2 %v583_v30 }
 0xc56   :  { %v441_v32 = vpop.permute.xlu2 %440 }
 0xc57   :  { %v443_v34 = vmul.f32 %v441_v32, %v435_v33 }
 0xc59   :  { %445 = vrot.lane.b32.xlu0 %v443_v34, %s712_s3 }
 0xccb   :  { %v446_v36 = vpop.permute.xlu0 %445 }
 0xccc   :  { %v448_v37 = vadd.f32 %v446_v36, %v438_v35 }
 0xcce   :  { %692 = vtanh.f32 %v448_v37 }
 0xcd4   :  { %v693_v38 = vpop.eup %692 }
 0xcd5   :  { %451 = vrot.lane.b32.xlu1 %v693_v38, %s711_s9 }
 0xd47   :  { %v452_v39 = vpop.permute.xlu1 %451 }
 0xd48   :  { %v454_v40 = vmul.f32 %v452_v39, %v435_v33  ;;  %v11_v33 = vstv %s841_s5 }
 0xd49   :  { %12 = vst [vmem:[#allocation3] sm:$0x1] %v11_v33 }
 0xd4a   :  { %457 = vrot.lane.b32.xlu2 %v454_v40, %s712_s3 }
 0xd50   :  { %v645_v35 = vld [vmem:[#allocation3] ss:$0 sm:$0xff] }
 0xda4   :  { %v458_v41 = vpop.permute.xlu2 %457 }
 0xda5   :  { %636 = vmatmul.msk.f32.vlgmr.msrb.gmra.mxu0 %vm73_vm6, %v458_v41 }
 0xe22   :  { %v478_v43 = vpop.f32.mrf.mxu0 }
 0xe23   :  { %v481_v44 = vadd.f32 %v478_v43, %v455_v42 }
 0xe25   :  { %694 = vtanh.f32 %v481_v44  ;;  %v637_v46 = vmul.f32 -1.442695, %v481_v44 }
 0xe27   :  { %696 = vpow2.f32 %v637_v46 }
 0xe2b   :  { %v695_v45 = vpop.eup %694 }
 0xe2c   :  { %504 = vrot.lane.b32.xlu0 %v695_v45, %s711_s9 }
 0xe2d   :  { %v697_v47 = vpop.eup %696 }
 0xe2e   :  { %v485_v48 = vadd.f32 1.0, %v697_v47 }
 0xe30   :  { %698 = vrcp.f32 %v485_v48  ;;  %v497_v54 = vand.u32 2147483648, %v485_v48  ;;  %vm491_vm13 = vweird.f32 %v485_v48  ;;  %v495_v55 = vand.u32 2147483647, %v485_v48 }
 0xe32   :  { %v498_v57 = vor.u32 1.1754944e-38, %v497_v54  ;;  %vm496_vm15 = vcmp.eq.f32.partialorder %v495_v55, 8.507059e+37 }
 0xe36   :  { %v699_v49 = vpop.eup %698 }
 0xe37   :  { %v487_v50 = vmul.f32 %v699_v49, %v485_v48  ;;  %vm492_vm12 = vweird.f32 %v699_v49 }
 0xe38   :  { %vm493_vm14 = vmor %vm491_vm13, %vm492_vm12 }
 0xe39   :  { %v488_v51 = vsub.f32 1.0, %v487_v50 }
 0xe3b   :  { %v489_v52 = vmul.f32 %v699_v49, %v488_v51 }
 0xe3d   :  { %v490_v53 = vadd.f32 %v699_v49, %v489_v52 }
 0xe3f   :  { %v494_v56 = vsel %vm493_vm14, %v699_v49, %v490_v53 }
 0xe40   :  { %v499_v59 = vsel %vm496_vm15, %v498_v57, %v494_v56 }
 0xe41   :  { %v502_v61 = vmul.f32 %v499_v59, %v448_v37 }
 0xe9e   :  { %v505_v58 = vpop.permute.xlu0 %504 }
 0xe9f   :  { %v507_v60 = vmul.f32 %v505_v58, %v499_v59 }
 0xea1   :  { %509 = vrot.lane.b32.xlu1 %v507_v60, %s712_s3 }
 0xf13   :  { %v510_v62 = vpop.permute.xlu1 %509 }
 0xf14   :  { %v512_v63 = vadd.f32 %v510_v62, %v502_v61 }
 0xf16   :  { %700 = vtanh.f32 %v512_v63 }
 0xf1c   :  { %v701_v7 = vpop.eup %700 }
 0xf1d   :  { %515 = vrot.lane.b32.xlu2 %v701_v7, %s711_s9 }
 0xf77   :  { %v516_v0 = vpop.permute.xlu2 %515 }
 0xf78   :  { %v518_v1 = vmul.f32 %v516_v0, %v499_v59 }
 0xf7a   :  { %521 = vrot.lane.b32.xlu0 %v518_v1, %s712_s3 }
 0xfec   :  { %v522_v2 = vpop.permute.xlu0 %521 }
 0xfed   :  { %638 = vmatmul.msk.f32.vlgmr.msra.gmra.mxu1 %vm73_vm6, %v522_v2 }
0x106a   :  { %v542_v4 = vpop.f32.mrf.mxu1 }
0x106b   :  { %v545_v5 = vadd.f32 %v542_v4, %v519_v3 }
0x106d   :  { %702 = vtanh.f32 %v545_v5  ;;  %v639_v8 = vmul.f32 -1.442695, %v545_v5 }
0x106f   :  { %704 = vpow2.f32 %v639_v8 }
0x1073   :  { %v703_v6 = vpop.eup %702 }
0x1074   :  { %568 = vrot.lane.b32.xlu1 %v703_v6, %s711_s9 }
0x1075   :  { %v705_v9 = vpop.eup %704 }
0x1076   :  { %v549_v10 = vadd.f32 1.0, %v705_v9 }
0x1078   :  { %706 = vrcp.f32 %v549_v10  ;;  %v561_v16 = vand.u32 2147483648, %v549_v10  ;;  %vm555_vm2 = vweird.f32 %v549_v10  ;;  %v559_v17 = vand.u32 2147483647, %v549_v10 }
0x107a   :  { %v562_v19 = vor.u32 1.1754944e-38, %v561_v16  ;;  %vm560_vm1 = vcmp.eq.f32.partialorder %v559_v17, 8.507059e+37 }
0x107e   :  { %v707_v11 = vpop.eup %706 }
0x107f   :  { %v551_v12 = vmul.f32 %v707_v11, %v549_v10  ;;  %vm556_vm0 = vweird.f32 %v707_v11 }
0x1080   :  { %vm557_vm3 = vmor %vm555_vm2, %vm556_vm0 }
0x1081   :  { %v552_v13 = vsub.f32 1.0, %v551_v12 }
0x1083   :  { %v553_v14 = vmul.f32 %v707_v11, %v552_v13 }
0x1085   :  { %v554_v15 = vadd.f32 %v707_v11, %v553_v14 }
0x1087   :  { %v558_v18 = vsel %vm557_vm3, %v707_v11, %v554_v15 }
0x1088   :  { %v563_v21 = vsel %vm560_vm1, %v562_v19, %v558_v18 }
0x1089   :  { %v566_v23 = vmul.f32 %v563_v21, %v512_v63 }
0x10e6   :  { %v569_v20 = vpop.permute.xlu1 %568 }
0x10e7   :  { %v571_v22 = vmul.f32 %v569_v20, %v563_v21 }
0x10e9   :  { %573 = vrot.lane.b32.xlu2 %v571_v22, %s712_s3 }
0x1143   :  { %v574_v24 = vpop.permute.xlu2 %573 }
0x1144   :  { %v576_v25 = vadd.f32 %v574_v24, %v566_v23 }
0x1146   :  { %708 = vtanh.f32 %v576_v25 }
0x114c   :  { %v709_v26 = vpop.eup %708 }
0x114d   :  { %579 = vrot.lane.b32.xlu0 %v709_v26, %s711_s9 }
0x11bf   :  { %v580_v31 = vpop.permute.xlu0 %579 }
0x11c0   :  { %v582_v32 = vmul.f32 %v580_v31, %v563_v21 }
0x11c2   :  { %592 = vrot.lane.b32.xlu1 %v582_v32, %s712_s3 }
0x1234   :  { %v593_v34 = vpop.permute.xlu1 %592 }
0x1235   :  { %640 = vmatmul.msk.f32.vlgmr.msra.gmra.mxu2 %vm73_vm6, %v593_v34 }
0x12b8   :  { %v613_v36 = vpop.f32.mrf.mxu2 }
0x12b9   :  { %v614_v37 = vadd.f32 %v645_v35, %v613_v36 }
0x12bb   :  { %617 = vst.msk [vmem:[%s842_s6] sm:$0x3] %vm616_vm4, %v614_v37 }

</bundles_post_ra>
